<compile_context>
chip_gen: v7x
topology: tpu7x:2x2x1
jax: 0.10.0
libtpu: 0.0.40
codegen_flags: <defaults>
</compile_context>

<pallas_src>
import jax
import jax.numpy as jnp
from jax.experimental import pallas as pl
from jax.experimental.pallas import tpu as pltpu

_SUBLANE = 8  # sublane tile for float32 (bf16 would need 16, int8/fp8 32)


def _round_up(n, m):
    return ((n + m - 1) // m) * m


def _linear_kernel(x_ref, w_ref, b_ref, o_ref):
    # x: [TB, Din]   w: [Din, Dout]   b: [1, Dout]   o: [TB, Dout]
    x = x_ref[...]
    w = w_ref[...]
    din = x.shape[-1]
    if din <= 16:
        # Tiny contraction: unrolled VPU accumulate (4 broadcast-mul + add for
        # Din=4).  Avoids MXU push/drain latency and any padded-zero weight
        # tile.  `din` is a trace-time constant, so this unrolls statically.
        acc = b_ref[...].astype(jnp.float32)  # [1, Dout]
        for k in range(din):
            acc = acc + (x[:, k:k + 1].astype(jnp.float32)
                         * w[k:k + 1, :].astype(jnp.float32))
    else:
        # General path (if this wrapper is reused for bigger layers).
        acc = jnp.dot(x, w, preferred_element_type=jnp.float32)
        acc = acc + b_ref[...].astype(jnp.float32)
    o_ref[...] = acc.astype(o_ref.dtype)


def prepare_params(weight, bias):
    """One-time parameter prep, hoisted out of the per-call forward path.

    weight: [Dout, Din] (PyTorch nn.Linear layout)  ->  w_t: [Din, Dout]
    bias:   [Dout]                                  ->  b2:  [1, Dout]
    """
    w_t = jnp.asarray(weight).T
    b2 = jnp.asarray(bias).reshape(1, -1)
    return w_t, b2


def single_layer_nn(x, w_t, b2, *, batch_tile=2048):
    """Forward pass: out = x @ weight.T + bias.

    x:   [batch, input_dim]      float32
    w_t: [input_dim, output_dim] float32 (from prepare_params)
    b2:  [1, output_dim]         float32 (from prepare_params)
    returns [batch, output_dim]  float32
    """
    B, Din = x.shape
    Din_w, Dout = w_t.shape
    assert Din == Din_w, (Din, Din_w)

    if B <= batch_tile:
        # Small/medium batch: single grid-less call, whole-array VMEM blocks.
        # x is passed UNPADDED -- full-array blocks are legal at any shape and
        # Mosaic pads sublanes/lanes inside VMEM only (no HBM staging buffer).
        return pl.pallas_call(
            _linear_kernel,
            out_shape=jax.ShapeDtypeStruct((B, Dout), x.dtype),
            in_specs=[
                pl.BlockSpec(memory_space=pltpu.VMEM),
                pl.BlockSpec(memory_space=pltpu.VMEM),
                pl.BlockSpec(memory_space=pltpu.VMEM),
            ],
            out_specs=pl.BlockSpec(memory_space=pltpu.VMEM),
        )(x, w_t, b2)

    # Large batch: tile ONLY the batch axis.  x / out stay narrow in HBM
    # (block last dim == array last dim, so no 128-lane HBM padding), and the
    # weight/bias blocks equal their full (tiny) arrays.  Guarantee >= 2 grid
    # steps so the "parallel" axis can be split across v7x's two TensorCores;
    # double-buffered VMEM is ~tb * 128 lanes * 4 B per buffer -- a few MiB.
    tb = min(batch_tile, _round_up(-(-B // 2), _SUBLANE))
    grid = (pl.cdiv(B, tb),)
    return pl.pallas_call(
        _linear_kernel,
        out_shape=jax.ShapeDtypeStruct((B, Dout), x.dtype),
        grid=grid,
        in_specs=[
            pl.BlockSpec((tb, Din), lambda i: (i, 0)),
            pl.BlockSpec((Din, Dout), lambda i: (0, 0)),
            pl.BlockSpec((1, Dout), lambda i: (0, 0)),
        ],
        out_specs=pl.BlockSpec((tb, Dout), lambda i: (i, 0)),
        compiler_params=pltpu.CompilerParams(
            dimension_semantics=("parallel",)
        ),
    )(x, w_t, b2)


if __name__ == "__main__":
    key = jax.random.PRNGKey(0)
    k_x, k_w, k_b, k_x2 = jax.random.split(key, 4)

    input_dim, output_dim, batch = 4, 3, 8

    # Deterministic synthetic parameters (nn.Linear(4, 3) shapes).
    # PyTorch default init is U(-1/sqrt(fan_in), 1/sqrt(fan_in)); mimic that.
    bound = 1.0 / (input_dim ** 0.5)
    weight = jax.random.uniform(
        k_w, (output_dim, input_dim), jnp.float32, -bound, bound
    )
    bias = jax.random.uniform(k_b, (output_dim,), jnp.float32, -bound, bound)

    # Parameter prep happens ONCE, outside the forward path.
    w_t, b2 = prepare_params(weight, bias)

    # Iris-sized batch: exercises the grid-less small-batch path.
    x = jax.random.normal(k_x, (batch, input_dim), jnp.float32)
    out = jax.block_until_ready(single_layer_nn(x, w_t, b2))
    ref = x @ weight.T + bias
    assert out.shape == (batch, output_dim)
    assert jnp.allclose(out, ref, atol=1e-5, rtol=1e-5)

    # Larger batch: exercises the batch-tiled "parallel" grid path.
    x_big = jax.random.normal(k_x2, (4096, input_dim), jnp.float32)
    out_big = jax.block_until_ready(single_layer_nn(x_big, w_t, b2))
    ref_big = x_big @ weight.T + bias
    assert out_big.shape == (4096, output_dim)
    assert jnp.allclose(out_big, ref_big, atol=1e-5, rtol=1e-5)

    print("KERNEL_OK")
</pallas_src>

<mosaic_0001>
module attributes {stable_mosaic.version = 11 : i64} {
  func.func @_linear_kernel(%arg0: memref<8x4xf32, #tpu.memory_space<vmem>>, %arg1: memref<4x3xf32, #tpu.memory_space<vmem>>, %arg2: memref<1x3xf32, #tpu.memory_space<vmem>>, %arg3: memref<8x3xf32, #tpu.memory_space<vmem>>) attributes {dimension_semantics = [], scalar_prefetch = 0 : i64, scratch_operands = 0 : i64, tpu.core_type = #tpu.core_type<tc>} {
    %c0 = arith.constant 0 : index
    %c0_0 = arith.constant 0 : index
    %0 = vector.load %arg0[%c0, %c0_0] : memref<8x4xf32, #tpu.memory_space<vmem>>, vector<8x4xf32>
    %c0_1 = arith.constant 0 : index
    %c0_2 = arith.constant 0 : index
    %1 = vector.load %arg1[%c0_1, %c0_2] : memref<4x3xf32, #tpu.memory_space<vmem>>, vector<4x3xf32>
    %c0_3 = arith.constant 0 : index
    %c0_4 = arith.constant 0 : index
    %2 = vector.load %arg2[%c0_3, %c0_4] : memref<1x3xf32, #tpu.memory_space<vmem>>, vector<1x3xf32>
    %3 = vector.extract_strided_slice %0 {offsets = [0, 0], sizes = [8, 1], strides = [1, 1]} : vector<8x4xf32> to vector<8x1xf32>
    %4 = vector.extract_strided_slice %1 {offsets = [0, 0], sizes = [1, 3], strides = [1, 1]} : vector<4x3xf32> to vector<1x3xf32>
    %5 = vector.broadcast %3 : vector<8x1xf32> to vector<8x3xf32>
    %6 = vector.broadcast %4 : vector<1x3xf32> to vector<8x3xf32>
    %7 = arith.mulf %5, %6 : vector<8x3xf32>
    %8 = vector.broadcast %2 : vector<1x3xf32> to vector<8x3xf32>
    %9 = arith.addf %8, %7 : vector<8x3xf32>
    %10 = vector.extract_strided_slice %0 {offsets = [0, 1], sizes = [8, 1], strides = [1, 1]} : vector<8x4xf32> to vector<8x1xf32>
    %11 = vector.extract_strided_slice %1 {offsets = [1, 0], sizes = [1, 3], strides = [1, 1]} : vector<4x3xf32> to vector<1x3xf32>
    %12 = vector.broadcast %10 : vector<8x1xf32> to vector<8x3xf32>
    %13 = vector.broadcast %11 : vector<1x3xf32> to vector<8x3xf32>
    %14 = arith.mulf %12, %13 : vector<8x3xf32>
    %15 = arith.addf %9, %14 : vector<8x3xf32>
    %16 = vector.extract_strided_slice %0 {offsets = [0, 2], sizes = [8, 1], strides = [1, 1]} : vector<8x4xf32> to vector<8x1xf32>
    %17 = vector.extract_strided_slice %1 {offsets = [2, 0], sizes = [1, 3], strides = [1, 1]} : vector<4x3xf32> to vector<1x3xf32>
    %18 = vector.broadcast %16 : vector<8x1xf32> to vector<8x3xf32>
    %19 = vector.broadcast %17 : vector<1x3xf32> to vector<8x3xf32>
    %20 = arith.mulf %18, %19 : vector<8x3xf32>
    %21 = arith.addf %15, %20 : vector<8x3xf32>
    %22 = vector.extract_strided_slice %0 {offsets = [0, 3], sizes = [8, 1], strides = [1, 1]} : vector<8x4xf32> to vector<8x1xf32>
    %23 = vector.extract_strided_slice %1 {offsets = [3, 0], sizes = [1, 3], strides = [1, 1]} : vector<4x3xf32> to vector<1x3xf32>
    %24 = vector.broadcast %22 : vector<8x1xf32> to vector<8x3xf32>
    %25 = vector.broadcast %23 : vector<1x3xf32> to vector<8x3xf32>
    %26 = arith.mulf %24, %25 : vector<8x3xf32>
    %27 = arith.addf %21, %26 : vector<8x3xf32>
    %c0_5 = arith.constant 0 : index
    %c0_6 = arith.constant 0 : index
    %28 = vector.load %arg3[%c0_5, %c0_6] : memref<8x3xf32, #tpu.memory_space<vmem>>, vector<8x3xf32>
    tpu.vector_store %arg3[%c0_5, %c0_6], %27 {strides = array<i32>} : memref<8x3xf32, #tpu.memory_space<vmem>>, vector<8x3xf32>,
    return
  }
}

</mosaic_0001>

<bundles_post_ra>
// kernel: tpu_custom_call.1
= control target key start
LH: loop header
LB: loop body
LE: loop exit
PB: predicated region body
PF: predicated region fallthrough
CT: control target
= control target key end

     0   :  { %v80_v0 = vmov 0   ;;  %v81_v2 = vmov 2   ;;  %v82_v3 = vmov 1   ;;  %v83_v4 = vmov 3   ;;  %s116_s0 = inlined_call_operand.vmem [shape: f32[8,4], index: 0, kind: input, shape index: {}]   ;;  %s117_s1 = inlined_call_operand.vmem [shape: f32[4,3], index: 1, kind: input, shape index: {}]   ;;  %s118_s2 = inlined_call_operand.vmem [shape: f32[1,3], index: 2, kind: input, shape index: {}]   ;;  %s119_s3 = inlined_call_operand.vmem [shape: f32[8,3], index: 3, kind: output, shape index: {}]  }
   0x1   :  { %75 = vset.pattern.permute.xlu0 %v80_v0  ;;  %v14_v1 = vld [vmem:[%s116_s0] sm:$0xff]  ;;  %77 = vset.pattern.permute.xlu1 %v81_v2  ;;  %v22_v5 = vlaneseq  ;;  %vm64_vm0 = vcmask 23552  }
   0x2   :  { %19 = vperm.xlu0 %75, %v14_v1   ;;  %45 = vperm.xlu1 %77, %v14_v1   ;;  %v15_v8 = vld [vmem:[%s117_s1] sm:$0xf] }
   0x3   :  { %v23_v6 = vshrl.u32 %v22_v5, 7  ;;  %v70_v17 = vld [vmem:[%s118_s2] ss:$0 sm:$0xff] }
   0x5   :  { %v24_v7 = vsub.s32 0, %v23_v6  ;;  %v40_v10 = vsub.s32 1, %v23_v6  ;;  %v50_v12 = vsub.s32 2, %v23_v6  ;;  %v60_v14 = vsub.s32 3, %v23_v6 }
   0x6   :  { %76 = vset.pattern.permute.xlu0 %v82_v3  ;;  %78 = vset.pattern.permute.xlu1 %v83_v4 }
   0x7   :  { %35 = vperm.xlu0 %76, %v14_v1   ;;  %55 = vperm.xlu1 %78, %v14_v1   ;;  %v25_v9 = vrot.slane %v15_v8, %v24_v7  ;;  %v41_v16 = vrot.slane %v15_v8, %v40_v10  ;;  %v51_v18 = vrot.slane %v15_v8, %v50_v12 }
   0x8   :  { %v61_v19 = vrot.slane %v15_v8, %v60_v14 }
   0xb   :  { %79 = vset.pattern.permute.xlu0 %v83_v4 }
  0x81   :  { %v20_v11 = vpop.permute.xlu0 %19  ;;  %v46_v13 = vpop.permute.xlu1 %45 }
  0x82   :  { %v26_v15 = vmul.f32 %v25_v9, %v20_v11  ;;  %v52_v24 = vmul.f32 %v51_v18, %v46_v13 }
  0x84   :  { %v33_v22 = vadd.f32 %v70_v17, %v26_v15 }
  0x86   :  { %v36_v20 = vpop.permute.xlu0 %35  ;;  %v56_v21 = vpop.permute.xlu1 %55 }
  0x87   :  { %v42_v23 = vmul.f32 %v41_v16, %v36_v20  ;;  %v62_v26 = vmul.f32 %v61_v19, %v56_v21 }
  0x89   :  { %v43_v25 = vadd.f32 %v42_v23, %v33_v22 }
  0x8b   :  { %v53_v27 = vadd.f32 %v52_v24, %v43_v25 }
  0x8d   :  { %v63_v28 = vadd.f32 %v62_v26, %v53_v27 }
  0x8f   :  { %65 = vst.msk [vmem:[%s119_s3] sm:$0xff] %vm64_vm0, %v63_v28 }

</bundles_post_ra>
